<compile_context>
chip_gen: v5e
topology: v5e:2x2
jax: 0.10.0
libtpu: 0.0.40
codegen_flags: <defaults>
</compile_context>

<pallas_src>
import functools

import jax
import jax.numpy as jnp
from jax.experimental import pallas as pl
from jax.experimental.pallas import tpu as pltpu


def _generator_kernel(x_ref, w1_ref, b1_ref, w2_ref, b2_ref, w3_ref, b3_ref,
                      o_ref, *, bf16_epilogue):
    # bf16 MXU operands, f32 accumulation via preferred_element_type.
    x = x_ref[...].astype(jnp.bfloat16)

    a1 = jnp.dot(x, w1_ref[...], preferred_element_type=jnp.float32)
    if bf16_epilogue:
        # Cast the accumulator once, do bias+tanh in bf16 (safe: tanh in [-1,1]),
        # result feeds the next dot directly (which wants bf16 anyway).
        h1 = jnp.tanh(a1.astype(jnp.bfloat16) + b1_ref[...].astype(jnp.bfloat16))
    else:
        h1 = jnp.tanh(a1 + b1_ref[...]).astype(jnp.bfloat16)

    a2 = jnp.dot(h1, w2_ref[...], preferred_element_type=jnp.float32)
    if bf16_epilogue:
        h2 = jnp.tanh(a2.astype(jnp.bfloat16) + b2_ref[...].astype(jnp.bfloat16))
    else:
        h2 = jnp.tanh(a2 + b2_ref[...]).astype(jnp.bfloat16)

    # Final layer: narrow-N matmul (one MXU pass either way); bias add in f32.
    a3 = jnp.dot(h2, w3_ref[...], preferred_element_type=jnp.float32)
    o_ref[...] = (a3 + b3_ref[...]).astype(o_ref.dtype)


def _default_bf16_epilogue():
    """bf16 VPU/EUP exists on v6e/v7x; keep the f32 epilogue on v5 chips."""
    try:
        kind = jax.devices()[0].device_kind.lower()
    except Exception:  # pragma: no cover - conservative fallback
        return False
    return "v5" not in kind


def _pick_tile_m(B):
    """Choose the batch tile.

    Goals: (a) >=4 grid steps when B allows it, so v7x's two TensorCores each
    get >=2 steps and single-TC chips get input/output DMA overlap with
    compute; (b) as large as possible (up to 4096 rows) to amortize the
    ~0.35us per-step overhead on v5e/v6e; (c) multiple of 8, divides B.
    """
    if B <= 256:
        return B
    for cand in (4096, 2048, 1024, 512, 256):          # >= 4 steps
        if B % cand == 0 and B // cand >= 4:
            return cand
    for cand in (4096, 2048, 1024, 512, 256, 128):     # >= 2 steps
        if B % cand == 0 and B // cand >= 2:
            return cand
    for cand in (4096, 2048, 1024, 512, 256, 128, 64, 32, 16, 8):
        if B % cand == 0:
            return cand
    return B  # odd batch size: single tile


def prepare_generator_params(params):
    """One-time weight prep (hoisted out of the forward): bf16 weights for the
    MXU (halves weight VMEM + DMA), biases stay f32."""
    return {
        "w1": params["w1"].astype(jnp.bfloat16),
        "w2": params["w2"].astype(jnp.bfloat16),
        "w3": params["w3"].astype(jnp.bfloat16),
        "b1": params["b1"].astype(jnp.float32),
        "b2": params["b2"].astype(jnp.float32),
        "b3": params["b3"].astype(jnp.float32),
    }


def generator_forward(x, prep, *, tile_m=None, bf16_epilogue=None):
    """x: (B, nz) float32. prep: output of prepare_generator_params."""
    B, nz = x.shape
    w1, b1 = prep["w1"], prep["b1"]
    w2, b2 = prep["w2"], prep["b2"]
    w3, b3 = prep["w3"], prep["b3"]
    hidden = w1.shape[1]
    nc = w3.shape[1]

    if bf16_epilogue is None:
        bf16_epilogue = _default_bf16_epilogue()

    if tile_m is None:
        tile_m = _pick_tile_m(B)
    assert B % tile_m == 0
    assert tile_m == B or tile_m % 8 == 0, "tile_m must be a multiple of 8"

    grid = (B // tile_m,)

    # Weights/biases: constant block index across the grid -> DMA'd once,
    # VMEM-resident for the whole call.
    full = lambda shape: pl.BlockSpec(shape, lambda i: (0, 0))

    flops = 2 * B * (nz * hidden + hidden * hidden + hidden * nc)
    transcendentals = 2 * B * hidden  # two tanh layers
    bytes_accessed = (
        B * nz * x.dtype.itemsize                                   # x
        + (nz * hidden + hidden * hidden + hidden * nc) * 2         # bf16 weights
        + (hidden + hidden + nc) * 4                                # f32 biases
        + B * nc * x.dtype.itemsize                                 # true output
    )

    kernel = functools.partial(_generator_kernel, bf16_epilogue=bf16_epilogue)

    out = pl.pallas_call(
        kernel,
        out_shape=jax.ShapeDtypeStruct((B, nc), x.dtype),
        grid_spec=pltpu.PrefetchScalarGridSpec(
            num_scalar_prefetch=0,
            grid=grid,
            in_specs=[
                pl.BlockSpec((tile_m, nz), lambda i: (i, 0)),  # x tile (streamed)
                full((nz, hidden)),                            # w1 (bf16)
                full((1, hidden)),                             # b1 (f32)
                full((hidden, hidden)),                        # w2 (bf16)
                full((1, hidden)),                             # b2 (f32)
                full((hidden, nc)),                            # w3 (bf16, unpadded)
                full((1, nc)),                                 # b3 (f32, unpadded)
            ],
            # Unpadded output block: nc equals the full last dim, so this is
            # legal; the few masked stores per tile are far cheaper than the
            # old 128-lane-padded f32 writeback + wrapper slice.
            out_specs=pl.BlockSpec((tile_m, nc), lambda i: (i, 0)),
        ),
        compiler_params=pltpu.CompilerParams(
            # Batch axis is independent -> megacore-shardable on v7x.
            dimension_semantics=("parallel",),
        ),
        cost_estimate=pl.CostEstimate(
            flops=flops,
            transcendentals=transcendentals,
            bytes_accessed=bytes_accessed,
        ),
    )(x, w1, b1, w2, b2, w3, b3)

    return out


def init_generator_params(key, nz, nc, hidden=128, dtype=jnp.float32):
    """Deterministic synthetic init (PyTorch-Linear-like uniform fan-in scaling)."""
    ks = jax.random.split(key, 6)

    def lin(kw, kb, fan_in, fan_out):
        bound = 1.0 / jnp.sqrt(fan_in)
        w = jax.random.uniform(kw, (fan_in, fan_out), dtype, -bound, bound)
        b = jax.random.uniform(kb, (1, fan_out), dtype, -bound, bound)
        return w, b

    w1, b1 = lin(ks[0], ks[1], nz, hidden)
    w2, b2 = lin(ks[2], ks[3], hidden, hidden)
    w3, b3 = lin(ks[4], ks[5], hidden, nc)
    return {"w1": w1, "b1": b1, "w2": w2, "b2": b2, "w3": w3, "b3": b3}


def reference_forward(x, p):
    h1 = jnp.tanh(x @ p["w1"] + p["b1"])
    h2 = jnp.tanh(h1 @ p["w2"] + p["b2"])
    return h2 @ p["w3"] + p["b3"]


if __name__ == "__main__":
    key = jax.random.PRNGKey(0)
    k_x, k_p = jax.random.split(key)

    # Small shapes consistent with the module: nz latent dim, nc output channels.
    B, nz, nc = 8, 32, 8
    x = jax.random.normal(k_x, (B, nz), dtype=jnp.float32)
    params = init_generator_params(k_p, nz, nc)
    prep = prepare_generator_params(params)  # hoisted one-time weight prep

    out = generator_forward(x, prep)
    out = jax.block_until_ready(out)

    ref = reference_forward(x, params)
    assert out.shape == (B, nc)
    # bf16 MXU operands + bf16 tanh epilogue (v6e/v7x) vs f32 reference
    # -> loosened tolerance (expected error ~1e-2 through three layers).
    assert jnp.allclose(out, ref, atol=7.5e-2, rtol=7.5e-2), "mismatch vs reference"

    print("KERNEL_OK")
</pallas_src>

<mosaic_0001>
module attributes {stable_mosaic.version = 11 : i64} {
  func.func @_generator_kernel(%arg0: i32, %arg1: memref<8x32xf32, #tpu.memory_space<vmem>>, %arg2: memref<32x128xbf16, #tpu.memory_space<vmem>>, %arg3: memref<1x128xf32, #tpu.memory_space<vmem>>, %arg4: memref<128x128xbf16, #tpu.memory_space<vmem>>, %arg5: memref<1x128xf32, #tpu.memory_space<vmem>>, %arg6: memref<128x8xbf16, #tpu.memory_space<vmem>>, %arg7: memref<1x8xf32, #tpu.memory_space<vmem>>, %arg8: memref<8x8xf32, #tpu.memory_space<vmem>>) attributes {dimension_semantics = [#tpu.dimension_semantics<parallel>], iteration_bounds = array<i64: 1>, scalar_prefetch = 0 : i64, scratch_operands = 0 : i64, tpu.core_type = #tpu.core_type<tc>, window_params = [{transform_indices = @transform_0, window_bounds = array<i64: 8, 32>}, {pipeline_mode = #tpu.pipeline_mode<synchronous>, transform_indices = @transform_1, window_bounds = array<i64: 32, 128>}, {pipeline_mode = #tpu.pipeline_mode<synchronous>, transform_indices = @transform_2, window_bounds = array<i64: 1, 128>}, {pipeline_mode = #tpu.pipeline_mode<synchronous>, transform_indices = @transform_3, window_bounds = array<i64: 128, 128>}, {pipeline_mode = #tpu.pipeline_mode<synchronous>, transform_indices = @transform_4, window_bounds = array<i64: 1, 128>}, {pipeline_mode = #tpu.pipeline_mode<synchronous>, transform_indices = @transform_5, window_bounds = array<i64: 128, 8>}, {pipeline_mode = #tpu.pipeline_mode<synchronous>, transform_indices = @transform_6, window_bounds = array<i64: 1, 8>}, {transform_indices = @transform_7, window_bounds = array<i64: 8, 8>}]} {
    %c0 = arith.constant 0 : index
    %c0_0 = arith.constant 0 : index
    %0 = vector.load %arg1[%c0, %c0_0] : memref<8x32xf32, #tpu.memory_space<vmem>>, vector<8x32xf32>
    %1 = arith.truncf %0 : vector<8x32xf32> to vector<8x32xbf16>
    %c0_1 = arith.constant 0 : index
    %c0_2 = arith.constant 0 : index
    %2 = vector.load %arg2[%c0_1, %c0_2] : memref<32x128xbf16, #tpu.memory_space<vmem>>, vector<32x128xbf16>
    %cst = arith.constant dense<0.000000e+00> : vector<8x128xf32>
    %3 = tpu.matmul %1, %2, %cst {dimension_numbers = #tpu.dot_dimension_numbers<[1], [0], [0], [1], [0, 0, 1, 1], [], []>} : vector<8x32xbf16>, vector<32x128xbf16>, vector<8x128xf32> -> vector<8x128xf32>
    %4 = arith.truncf %3 : vector<8x128xf32> to vector<8x128xbf16>
    %c0_3 = arith.constant 0 : index
    %c0_4 = arith.constant 0 : index
    %5 = vector.load %arg3[%c0_3, %c0_4] : memref<1x128xf32, #tpu.memory_space<vmem>>, vector<1x128xf32>
    %6 = arith.truncf %5 : vector<1x128xf32> to vector<1x128xbf16>
    %7 = vector.broadcast %6 : vector<1x128xbf16> to vector<8x128xbf16>
    %8 = arith.addf %4, %7 : vector<8x128xbf16>
    %9 = math.tanh %8 : vector<8x128xbf16>
    %c0_5 = arith.constant 0 : index
    %c0_6 = arith.constant 0 : index
    %10 = vector.load %arg4[%c0_5, %c0_6] : memref<128x128xbf16, #tpu.memory_space<vmem>>, vector<128x128xbf16>
    %cst_7 = arith.constant dense<0.000000e+00> : vector<8x128xf32>
    %11 = tpu.matmul %9, %10, %cst_7 {dimension_numbers = #tpu.dot_dimension_numbers<[1], [0], [0], [1], [0, 0, 1, 1], [], []>} : vector<8x128xbf16>, vector<128x128xbf16>, vector<8x128xf32> -> vector<8x128xf32>
    %12 = arith.truncf %11 : vector<8x128xf32> to vector<8x128xbf16>
    %c0_8 = arith.constant 0 : index
    %c0_9 = arith.constant 0 : index
    %13 = vector.load %arg5[%c0_8, %c0_9] : memref<1x128xf32, #tpu.memory_space<vmem>>, vector<1x128xf32>
    %14 = arith.truncf %13 : vector<1x128xf32> to vector<1x128xbf16>
    %15 = vector.broadcast %14 : vector<1x128xbf16> to vector<8x128xbf16>
    %16 = arith.addf %12, %15 : vector<8x128xbf16>
    %17 = math.tanh %16 : vector<8x128xbf16>
    %c0_10 = arith.constant 0 : index
    %c0_11 = arith.constant 0 : index
    %18 = vector.load %arg6[%c0_10, %c0_11] : memref<128x8xbf16, #tpu.memory_space<vmem>>, vector<128x8xbf16>
    %cst_12 = arith.constant dense<0.000000e+00> : vector<8x8xf32>
    %19 = tpu.matmul %17, %18, %cst_12 {dimension_numbers = #tpu.dot_dimension_numbers<[1], [0], [0], [1], [0, 0, 1, 1], [], []>} : vector<8x128xbf16>, vector<128x8xbf16>, vector<8x8xf32> -> vector<8x8xf32>
    %c0_13 = arith.constant 0 : index
    %c0_14 = arith.constant 0 : index
    %20 = vector.load %arg7[%c0_13, %c0_14] : memref<1x8xf32, #tpu.memory_space<vmem>>, vector<1x8xf32>
    %21 = vector.broadcast %20 : vector<1x8xf32> to vector<8x8xf32>
    %22 = arith.addf %19, %21 : vector<8x8xf32>
    %c0_15 = arith.constant 0 : index
    %c0_16 = arith.constant 0 : index
    %23 = vector.load %arg8[%c0_15, %c0_16] : memref<8x8xf32, #tpu.memory_space<vmem>>, vector<8x8xf32>
    tpu.vector_store %arg8[%c0_15, %c0_16], %22 {strides = array<i32>} : memref<8x8xf32, #tpu.memory_space<vmem>>, vector<8x8xf32>,
    return
  }
  func.func @transform_0(%arg0: i32) -> (i32, i32) {
    %c0_i32 = arith.constant 0 : i32
    %c0_i32_0 = arith.constant 0 : i32
    return %arg0, %c0_i32 : i32, i32
  }
  func.func @transform_1(%arg0: i32) -> (i32, i32) {
    %c0_i32 = arith.constant 0 : i32
    %c0_i32_0 = arith.constant 0 : i32
    %c0_i32_1 = arith.constant 0 : i32
    return %c0_i32, %c0_i32_0 : i32, i32
  }
  func.func @transform_2(%arg0: i32) -> (i32, i32) {
    %c0_i32 = arith.constant 0 : i32
    %c0_i32_0 = arith.constant 0 : i32
    %c0_i32_1 = arith.constant 0 : i32
    return %c0_i32, %c0_i32_0 : i32, i32
  }
  func.func @transform_3(%arg0: i32) -> (i32, i32) {
    %c0_i32 = arith.constant 0 : i32
    %c0_i32_0 = arith.constant 0 : i32
    %c0_i32_1 = arith.constant 0 : i32
    return %c0_i32, %c0_i32_0 : i32, i32
  }
  func.func @transform_4(%arg0: i32) -> (i32, i32) {
    %c0_i32 = arith.constant 0 : i32
    %c0_i32_0 = arith.constant 0 : i32
    %c0_i32_1 = arith.constant 0 : i32
    return %c0_i32, %c0_i32_0 : i32, i32
  }
  func.func @transform_5(%arg0: i32) -> (i32, i32) {
    %c0_i32 = arith.constant 0 : i32
    %c0_i32_0 = arith.constant 0 : i32
    %c0_i32_1 = arith.constant 0 : i32
    return %c0_i32, %c0_i32_0 : i32, i32
  }
  func.func @transform_6(%arg0: i32) -> (i32, i32) {
    %c0_i32 = arith.constant 0 : i32
    %c0_i32_0 = arith.constant 0 : i32
    %c0_i32_1 = arith.constant 0 : i32
    return %c0_i32, %c0_i32_0 : i32, i32
  }
  func.func @transform_7(%arg0: i32) -> (i32, i32) {
    %c0_i32 = arith.constant 0 : i32
    %c0_i32_0 = arith.constant 0 : i32
    return %arg0, %c0_i32 : i32, i32
  }
}

</mosaic_0001>

<bundles_post_ra>
// kernel: tpu_custom_call.1
= control target key start
LH: loop header
LB: loop body
LE: loop exit
PB: predicated region body
PF: predicated region fallthrough
CT: control target
= control target key end

     0   :  { %12 = vsyncpa [#allocation3], 0  ;;  %s589_s0 = inlined_call_operand.hbm [shape: f32[8,32], index: 0, kind: input, shape index: {}]   ;;  %s590_s1 = inlined_call_operand.hbm [shape: bf16[32,128], index: 1, kind: input, shape index: {}]   ;;  %s591_s2 = inlined_call_operand.vmem [shape: f32[1,128], index: 2, kind: input, shape index: {}]   ;;  %s592_s3 = inlined_call_operand.vmem [shape: bf16[128,128], index: 3, kind: input, shape index: {}]   ;;  %s593_s4 = inlined_call_operand.vmem [shape: f32[1,128], index: 4, kind: input, shape index: {}]   ;;  %s594_s5 = inlined_call_operand.vmem [shape: bf16[128,8], index: 5, kind: input, shape index: {}]   ;;  %s595_s6 = inlined_call_operand.vmem [shape: f32[1,8], index: 6, kind: input, shape index: {}]   ;;  %s596_s7 = inlined_call_operand.hbm [shape: f32[8,8], index: 7, kind: output, shape index: {}]  }
   0x1   :  { %13 = vsyncpa [#allocation6], 0 }
   0x2   :  { %14 = vsyncpa [#allocation4], 0  ;;  %s20_s26 = sshll.u32 %s589_s0, 4  ;;  %s478_s27 = smov [#allocation2]   ;;  %s21_s26 = int_to_ptr.hbm [resolvable:$true] %s20_s26 }
   0x3   :  { %s22_s28 = sshll.u32 %s478_s27, 4  ;;  %s30_s8 = sshll.u32 %s590_s1, 4  ;;  %s23_s28 = int_to_ptr.vmem [resolvable:$true] %s22_s28  ;;  %s31_s8 = int_to_ptr.hbm [resolvable:$true] %s30_s8 }
   0x4   :  { %25 = dma.hbm_to_vmem [thread:$0]  %s21_s26, 128, %s23_s28, [#allocation3]  }
   0x5   :  { %s479_s9 = smov [#allocation5]   ;;  %s480_s11 = smov 64  }
   0x6   :  { %s32_s10 = sshll.u32 %s479_s9, 4  ;;  %s481_s12 = smov 4   ;;  %s33_s10 = int_to_ptr.vmem [resolvable:$true] %s32_s10 }
   0x7   :  { %38 = dma.hbm_to_vmem [thread:$0]  %s31_s8, 256, %s33_s10, [#allocation6], %s480_s11, %s480_s11, %s481_s12  }
   0x8   :  { %472 = dma.done.wait [#allocation3], 128  }
   0x9   :  { %473 = vsyncadd [#allocation3], 4294967168 }
   0xa   :  { %474 = dma.done.wait [#allocation6], 256  }
   0xb   :  { %475 = vsyncadd [#allocation6], 4294967040  ;;  %v373_v0 = vld [vmem:[#allocation5 + $0x8] sm:$0xff]  ;;  %v381_v1 = vld [vmem:[%s592_s3 + $0x38] sm:$0xff]  ;;  %vm76_vm0 = vcmask 261120   ;;  %s288_s24 = sshll.u32 %s596_s7, 4  ;;  %s289_s24 = int_to_ptr.hbm [resolvable:$true] %s288_s24 }
   0xc   :  { %86 = vmatpush.bf16.msra.mxu0 %v373_v0  ;;  %v372_v2 = vld [vmem:[#allocation5] sm:$0xff]  ;;  %v58_v3 = vld [vmem:[#allocation2] sm:$0xff]  ;;  %171 = vmatpush.bf16.msra.mxu1 %v381_v1  ;;  %v380_v4 = vld [vmem:[%s592_s3 + $0x30] sm:$0xff]  ;;  %vm279_vm1 = vcmask 64512  }
   0xd   :  { %v59_v5 = vpack.c.bf16 %v58_v3, %v58_v3  ;;  %v379_v6 = vld [vmem:[%s592_s3 + $0x28] sm:$0xff]  ;;  %v378_v7 = vld [vmem:[%s592_s3 + $0x20] sm:$0xff]  ;;  %v377_v8 = vld [vmem:[%s592_s3 + $0x18] sm:$0xff] }
   0xe   :  { %v376_v9 = vld [vmem:[%s592_s3 + $0x10] sm:$0xff]  ;;  %v375_v10 = vld [vmem:[%s592_s3 + $0x8] sm:$0xff]  ;;  %v374_v11 = vld [vmem:[%s592_s3] sm:$0xff] }
   0xf   :  { %v94_v12 = vld [vmem:[%s591_s2] sm:$0x1]  ;;  %v389_v13 = vld [vmem:[%s594_s5 + $0x38] sm:$0xff]  ;;  %v388_v15 = vld [vmem:[%s594_s5 + $0x30] sm:$0xff] }
  0x10   :  { %87 = vmatpush.bf16.msra.mxu0 %v372_v2  ;;  %172 = vmatpush.bf16.msra.mxu1 %v380_v4  ;;  %v95_v14 = vpack.c.bf16 %v94_v12, %v94_v12  ;;  %v387_v17 = vld [vmem:[%s594_s5 + $0x28] sm:$0xff]  ;;  %v386_v29 = vld [vmem:[%s594_s5 + $0x20] sm:$0xff]  ;;  %v385_v30 = vld [vmem:[%s594_s5 + $0x18] sm:$0xff] }
  0x11   :  { %266 = vmatpush.bf16.msra.mxu2 %v389_v13  ;;  %v384_v31 = vld [vmem:[%s594_s5 + $0x10] sm:$0xff]  ;;  %v383_v32 = vld [vmem:[%s594_s5 + $0x8] sm:$0xff]  ;;  %v382_v33 = vld [vmem:[%s594_s5] sm:$0xff] }
  0x12   :  { %v97_v16 = vpack.i.b16 %v95_v14, %v95_v14  ;;  %v185_v34 = vld [vmem:[%s593_s4] sm:$0x1]  ;;  %s482_s4 = smov [#allocation7]  }
  0x13   :  { %307 = vmatmul.msk.bf16.vlgmr.msra.gmra.mxu0 %vm76_vm0, %v59_v5  ;;  %v186_v35 = vpack.c.bf16 %v185_v34, %v185_v34  ;;  %v395_v48 = vld [vmem:[%s595_s6] ss:$0 sm:$0xff]  ;;  %s286_s21 = sshll.u32 %s482_s4, 4  ;;  %s287_s21 = int_to_ptr.vmem [resolvable:$true] %s286_s21 }
  0x14   :  { %173 = vmatpush.bf16.msra.mxu1 %v379_v6  ;;  %v99_v18 = vperm.slane %v97_v16, 0 }
  0x15   :  { %267 = vmatpush.bf16.msra.mxu2 %v388_v15  ;;  %v188_v36 = vpack.i.b16 %v186_v35, %v186_v35 }
  0x16   :  { %v101_v21 = vunpack.c.l.bf16 %v99_v18 }
  0x17   :  { %v190_v37 = vperm.slane %v188_v36, 0 }
  0x18   :  { %174 = vmatpush.bf16.msra.mxu1 %v378_v7 }
  0x19   :  { %268 = vmatpush.bf16.msra.mxu2 %v387_v17  ;;  %v192_v40 = vunpack.c.l.bf16 %v190_v37 }
  0x1c   :  { %175 = vmatpush.bf16.msra.mxu1 %v377_v8 }
  0x1d   :  { %269 = vmatpush.bf16.msra.mxu2 %v386_v29 }
  0x20   :  { %176 = vmatpush.bf16.msra.mxu1 %v376_v9 }
  0x21   :  { %270 = vmatpush.bf16.msra.mxu2 %v385_v30 }
  0x24   :  { %177 = vmatpush.bf16.msra.mxu1 %v375_v10 }
  0x25   :  { %271 = vmatpush.bf16.msra.mxu2 %v384_v31 }
  0x28   :  { %178 = vmatpush.bf16.msra.mxu1 %v374_v11 }
  0x29   :  { %272 = vmatpush.bf16.msra.mxu2 %v383_v32 }
  0x2d   :  { %273 = vmatpush.bf16.msra.mxu2 %v382_v33 }
  0x90   :  { %v89_v19 = vpop.f32.mrf.mxu0 }
  0x91   :  { %v93_v20 = vpack.c.bf16 %v89_v19, %v89_v19 }
  0x93   :  { %v100_v22 = vunpack.c.l.bf16 %v93_v20 }
  0x95   :  { %v102_v23 = vadd.f32 %v101_v21, %v100_v22 }
  0x97   :  { %v103_v24 = vpack.c.bf16 %v102_v23, %v102_v23 }
  0x98   :  { %v91_v25 = vpop.f32.mrf.mxu0 }
  0x99   :  { %v104_v26 = vunpack.c.l.bf16 %v103_v24 }
  0x9b   :  { %396 = vtanh.f32 %v104_v26 }
  0xa1   :  { %v397_v27 = vpop.eup %396 }
  0xa2   :  { %v106_v28 = vpack.c.bf16 %v397_v27, %v397_v27 }
  0xa4   :  { %179 = vmatmul.bf16.vlgmr.msra.gmra.mxu1 %v106_v28 }
 0x121   :  { %v180_v38 = vpop.f32.mrf.mxu1 }
 0x122   :  { %v184_v39 = vpack.c.bf16 %v180_v38, %v180_v38 }
 0x124   :  { %v191_v41 = vunpack.c.l.bf16 %v184_v39 }
 0x126   :  { %v193_v42 = vadd.f32 %v192_v40, %v191_v41 }
 0x128   :  { %v194_v43 = vpack.c.bf16 %v193_v42, %v193_v42 }
 0x129   :  { %v182_v44 = vpop.f32.mrf.mxu1 }
 0x12a   :  { %v195_v45 = vunpack.c.l.bf16 %v194_v43 }
 0x12c   :  { %398 = vtanh.f32 %v195_v45 }
 0x132   :  { %v399_v46 = vpop.eup %398 }
 0x133   :  { %v197_v47 = vpack.c.bf16 %v399_v46, %v399_v46 }
 0x135   :  { %274 = vmatmul.bf16.vlgmr.msra.gmra.mxu2 %v197_v47 }
 0x1b8   :  { %v275_v49 = vpop.f32.mrf.mxu2 }
 0x1b9   :  { %v276_v50 = vadd.f32 %v395_v48, %v275_v49 }
 0x1bb   :  { %280 = vst.msk [vmem:[#allocation7] sm:$0xff] %vm279_vm1, %v276_v50 }
 0x1bc   :  { %291 = dma.vmem_to_hbm [thread:$0]  %s287_s21, 128, %s289_s24, [#allocation4]  }
 0x1c0   :  { %v277_v51 = vpop.f32.mrf.mxu2 }
 0x1c1   :  { %476 = dma.done.wait [#allocation4], 128  }
 0x1c2   :  { %477 = vsyncadd [#allocation4], 4294967168 }
 0x1c3   :  { %296 = vsyncpa [#allocation3], 1 }
 0x1c4   :  { %297 = vsyncpa [#allocation6], 1 }
 0x1c5   :  { %298 = vsyncpa [#allocation4], 1 }

</bundles_post_ra>
